<compile_context>
chip_gen: v7x
topology: tpu7x:2x2x1
jax: 0.10.0
libtpu: 0.0.40
codegen_flags: <defaults>
</compile_context>

<pallas_src>
import functools
import math

import jax
import jax.numpy as jnp
from jax import lax
from jax.experimental import pallas as pl
from jax.experimental.pallas import tpu as pltpu

_LANE = 128
_MAX_ROWS = 4096                      # (4096, 128) f32 = 2 MiB per block per stream
_VMEM_LIMIT = 32 * 1024 * 1024        # safe on v5e/v6e/v7x; covers 3 double-buffered streams


def _cdiv(a, b):
    return -(-a // b)


def _round_up(a, b):
    return _cdiv(a, b) * b


def _num_tensorcores():
    """TensorCores per chip: 1 on v5e/v6e, 2 on v7x (best-effort detection)."""
    try:
        kind = jax.devices()[0].device_kind.lower()
    except Exception:
        return 1
    return 2 if "v7" in kind else 1


# ----------------------------------------------------------------------------
# Fused kernel: per-chunk partials of sum(log(lk)) and sum((a - b)^2)
# ----------------------------------------------------------------------------
def _rd_fused_kernel(lk_ref, a_ref, b_ref, log_out_ref, sq_out_ref,
                     acc_log, acc_sq, *,
                     lk_rows, lk_rpb, lk_blocks,
                     mse_rows, mse_rpb, mse_blocks,
                     blocks_per_chunk):
    c = pl.program_id(0)                  # parallel chunk (TC split on v7x)
    k = pl.program_id(1)                  # sequential block within chunk
    step = c * blocks_per_chunk + k       # logical block index

    @pl.when(k == 0)
    def _():
        acc_log[...] = jnp.zeros_like(acc_log)
        acc_sq[...] = jnp.zeros_like(acc_sq)

    # ---------------- sum(log(likelihoods)) ----------------
    @pl.when(step < lk_blocks - 1)        # interior full blocks: unmasked fast path
    def _():
        v = jnp.log(lk_ref[...].astype(jnp.float32))
        acc_log[...] += jnp.sum(v.reshape(-1, 8, _LANE), axis=0)

    @pl.when(step == lk_blocks - 1)       # last (possibly ragged) block: masked
    def _():
        x = lk_ref[...].astype(jnp.float32)
        row_ids = step * lk_rpb + lax.broadcasted_iota(
            jnp.int32, (lk_rpb, _LANE), 0)
        x = jnp.where(row_ids < lk_rows, x, 1.0)   # mask BEFORE log: log(1)==0
        v = jnp.log(x)
        acc_log[...] += jnp.sum(v.reshape(-1, 8, _LANE), axis=0)
    # step >= lk_blocks: clamped overhang step, contributes nothing -> skipped

    # ---------------- sum((x_hat - target)^2) ----------------
    @pl.when(step < mse_blocks - 1)
    def _():
        d = a_ref[...].astype(jnp.float32) - b_ref[...].astype(jnp.float32)
        acc_sq[...] += jnp.sum((d * d).reshape(-1, 8, _LANE), axis=0)

    @pl.when(step == mse_blocks - 1)
    def _():
        d = a_ref[...].astype(jnp.float32) - b_ref[...].astype(jnp.float32)
        row_ids = step * mse_rpb + lax.broadcasted_iota(
            jnp.int32, (mse_rpb, _LANE), 0)
        d = jnp.where(row_ids < mse_rows, d, 0.0)  # mask BEFORE squaring
        acc_sq[...] += jnp.sum((d * d).reshape(-1, 8, _LANE), axis=0)

    @pl.when(k == pl.num_programs(1) - 1)
    def _():
        log_out_ref[0, 0] = jnp.sum(acc_log[...])  # single final cross-lane reduce
        sq_out_ref[0, 0] = jnp.sum(acc_sq[...])


# ----------------------------------------------------------------------------
# Glue
# ----------------------------------------------------------------------------
def _as_rows(x, pad_value):
    """(rows, 128) view of x.  No copy when numel % 128 == 0 (common case)."""
    flat = jnp.ravel(x)
    n = flat.shape[0]
    rem = n % _LANE
    if rem:
        flat = jnp.pad(flat, (0, _LANE - rem), constant_values=pad_value)
    return flat.reshape(-1, _LANE)


def _fused_sums(lk_2d, a_2d, b_2d, *, chunks=None):
    """Single pallas_call returning (sum(log(lk_2d)), sum((a_2d - b_2d)^2))."""
    lk_rows = lk_2d.shape[0]
    mse_rows = a_2d.shape[0]
    lk_rpb = min(_MAX_ROWS, _round_up(lk_rows, 32))
    mse_rpb = min(_MAX_ROWS, _round_up(mse_rows, 32))
    lk_blocks = _cdiv(lk_rows, lk_rpb)
    mse_blocks = _cdiv(mse_rows, mse_rpb)
    n_blocks = max(lk_blocks, mse_blocks)

    if chunks is None:
        chunks = _num_tensorcores()
    chunks = max(1, min(chunks, n_blocks))
    blocks_per_chunk = _cdiv(n_blocks, chunks)

    # Clamp so over-hanging grid steps re-read the last valid block; their
    # contribution is skipped in-kernel via pl.when.
    def lk_map(c, k):
        return (jnp.minimum(c * blocks_per_chunk + k, lk_blocks - 1), 0)

    def mse_map(c, k):
        return (jnp.minimum(c * blocks_per_chunk + k, mse_blocks - 1), 0)

    kernel = functools.partial(
        _rd_fused_kernel,
        lk_rows=lk_rows, lk_rpb=lk_rpb, lk_blocks=lk_blocks,
        mse_rows=mse_rows, mse_rpb=mse_rpb, mse_blocks=mse_blocks,
        blocks_per_chunk=blocks_per_chunk)

    log_parts, sq_parts = pl.pallas_call(
        kernel,
        out_shape=(jax.ShapeDtypeStruct((chunks, 1), jnp.float32),
                   jax.ShapeDtypeStruct((chunks, 1), jnp.float32)),
        grid=(chunks, blocks_per_chunk),
        in_specs=[pl.BlockSpec((lk_rpb, _LANE), lk_map),
                  pl.BlockSpec((mse_rpb, _LANE), mse_map),
                  pl.BlockSpec((mse_rpb, _LANE), mse_map)],
        out_specs=(pl.BlockSpec((1, 1), lambda c, k: (c, 0),
                                memory_space=pltpu.SMEM),
                   pl.BlockSpec((1, 1), lambda c, k: (c, 0),
                                memory_space=pltpu.SMEM)),
        scratch_shapes=[pltpu.VMEM((8, _LANE), jnp.float32),
                        pltpu.VMEM((8, _LANE), jnp.float32)],
        compiler_params=pltpu.CompilerParams(
            dimension_semantics=("parallel", "arbitrary"),
            vmem_limit_bytes=_VMEM_LIMIT),
    )(lk_2d, a_2d, b_2d)
    return jnp.sum(log_parts), jnp.sum(sq_parts)


# ----------------------------------------------------------------------------
# RateDistortionLoss forward
# ----------------------------------------------------------------------------
def rate_distortion_loss(output, target, lmbda=0.01):
    """output = {'x_hat': (N,C,H,W), 'likelihoods': {name: array, ...}}
    target = (N,C,H,W). Returns dict with bpp_loss, mse_loss, loss."""
    N, _, H, W = target.shape
    num_pixels = N * H * W

    # All likelihood tensors share the same 1/(-log2 * num_pixels) scale, so
    # their log-sums can be fused: ravel + concat into one lane-dense slab.
    lks = list(output['likelihoods'].values())
    if len(lks) == 1:
        lk_flat = jnp.ravel(lks[0])
    else:
        lk_flat = jnp.concatenate([jnp.ravel(lk) for lk in lks])

    lk_2d = _as_rows(lk_flat, pad_value=1.0)        # log(1) == 0 for the pad tail
    a_2d = _as_rows(output['x_hat'], pad_value=0.0)
    b_2d = _as_rows(target, pad_value=0.0)

    log_sum, sq_sum = _fused_sums(lk_2d, a_2d, b_2d)

    bpp_loss = log_sum / (-math.log(2) * num_pixels)

    n_elems = 1
    for d in output['x_hat'].shape:
        n_elems *= d
    mse_loss = sq_sum / jnp.float32(n_elems)

    loss = lmbda * (255 ** 2) * mse_loss + bpp_loss
    return {'bpp_loss': bpp_loss, 'mse_loss': mse_loss, 'loss': loss}


# ----------------------------------------------------------------------------
# Reference (pure JAX) for verification
# ----------------------------------------------------------------------------
def rate_distortion_loss_ref(output, target, lmbda=0.01):
    N, _, H, W = target.shape
    num_pixels = N * H * W
    bpp = sum(
        jnp.sum(jnp.log(lk)) / (-math.log(2) * num_pixels)
        for lk in output['likelihoods'].values()
    )
    mse = jnp.mean((output['x_hat'] - target) ** 2)
    return {
        'bpp_loss': bpp,
        'mse_loss': mse,
        'loss': lmbda * (255 ** 2) * mse + bpp,
    }


if __name__ == "__main__":
    key = jax.random.PRNGKey(0)
    k1, k2, k3, k4, k5, k6, k7 = jax.random.split(key, 7)

    # Small shapes consistent with a compression model forward:
    # target / x_hat in NCHW, likelihoods at reduced spatial resolutions.
    N, C, H, W = 2, 3, 16, 16
    target = jax.random.uniform(k1, (N, C, H, W), dtype=jnp.float32)
    x_hat = target + 0.05 * jax.random.normal(k2, (N, C, H, W),
                                              dtype=jnp.float32)
    likelihoods = {
        'y': jax.random.uniform(k3, (N, 4, H // 4, W // 4),
                                dtype=jnp.float32, minval=1e-4, maxval=1.0),
        'z': jax.random.uniform(k4, (N, 2, H // 8, W // 8),
                                dtype=jnp.float32, minval=1e-4, maxval=1.0),
    }
    output = {'x_hat': x_hat, 'likelihoods': likelihoods}

    lmbda = 0.01  # deterministic "parameter" from __init__

    got = rate_distortion_loss(output, target, lmbda=lmbda)
    jax.block_until_ready(got['loss'])

    want = rate_distortion_loss_ref(output, target, lmbda=lmbda)
    for k in ('bpp_loss', 'mse_loss', 'loss'):
        assert jnp.allclose(got[k], want[k], rtol=1e-5, atol=1e-5), (
            k, got[k], want[k])

    # Extra self-check: larger tensors exercising multi-block streaming, a
    # ragged last block on both streams, unequal block counts (lk: 3 blocks,
    # mse: 1 block), and the forced 2-chunk split with clamped overhang steps.
    lk_big = jax.random.uniform(k5, (20, 1, 250, 256), dtype=jnp.float32,
                                minval=1e-3, maxval=1.0)          # 1,280,000 elems
    a_big = jax.random.uniform(k6, (2, 16, 125, 128), dtype=jnp.float32)  # 512,000
    b_big = a_big + 0.05 * jax.random.normal(k7, a_big.shape, dtype=jnp.float32)

    got_log, got_sq = _fused_sums(_as_rows(lk_big, 1.0),
                                  _as_rows(a_big, 0.0),
                                  _as_rows(b_big, 0.0), chunks=2)
    jax.block_until_ready((got_log, got_sq))
    want_log = jnp.sum(jnp.log(lk_big))
    want_sq = jnp.sum((a_big - b_big) ** 2)
    assert jnp.allclose(got_log, want_log, rtol=2e-3), (got_log, want_log)
    assert jnp.allclose(got_sq, want_sq, rtol=2e-3), (got_sq, want_sq)

    print("KERNEL_OK")
</pallas_src>

<mosaic_0001>
module attributes {stable_mosaic.version = 11 : i64} {
  func.func @_rd_fused_kernel(%arg0: i32, %arg1: i32, %arg2: memref<32x128xf32, #tpu.memory_space<vmem>>, %arg3: memref<32x128xf32, #tpu.memory_space<vmem>>, %arg4: memref<32x128xf32, #tpu.memory_space<vmem>>, %arg5: memref<1x1xf32, #tpu.memory_space<smem>>, %arg6: memref<1x1xf32, #tpu.memory_space<smem>>, %arg7: memref<8x128xf32, #tpu.memory_space<vmem>>, %arg8: memref<8x128xf32, #tpu.memory_space<vmem>>) attributes {dimension_semantics = [#tpu.dimension_semantics<parallel>, #tpu.dimension_semantics<arbitrary>], iteration_bounds = array<i64: 1, 1>, scalar_prefetch = 0 : i64, scratch_operands = 2 : i64, tpu.core_type = #tpu.core_type<tc>, window_params = [{transform_indices = @transform_0, window_bounds = array<i64: 32, 128>}, {transform_indices = @transform_1, window_bounds = array<i64: 32, 128>}, {transform_indices = @transform_2, window_bounds = array<i64: 32, 128>}, {transform_indices = @transform_3, window_bounds = array<i64: 1, 1>}, {transform_indices = @transform_4, window_bounds = array<i64: 1, 1>}]} {
    %c1_i32 = arith.constant 1 : i32
    %0 = arith.muli %arg0, %c1_i32 : i32
    %1 = arith.addi %0, %arg1 : i32
    %c0_i32 = arith.constant 0 : i32
    %2 = arith.cmpi eq, %arg1, %c0_i32 : i32
    %3 = arith.extui %2 : i1 to i32
    %c0_i32_0 = arith.constant 0 : i32
    %4 = arith.cmpi ne, %3, %c0_i32_0 : i32
    scf.if %4 {
      %cst = arith.constant 0.000000e+00 : f32
      %20 = vector.broadcast %cst : f32 to vector<8x128xf32>
      %c0 = arith.constant 0 : index
      %c0_11 = arith.constant 0 : index
      %21 = vector.load %arg7[%c0, %c0_11] : memref<8x128xf32, #tpu.memory_space<vmem>>, vector<8x128xf32>
      tpu.vector_store %arg7[%c0, %c0_11], %20 {strides = array<i32>} : memref<8x128xf32, #tpu.memory_space<vmem>>, vector<8x128xf32>,
      %cst_12 = arith.constant 0.000000e+00 : f32
      %22 = vector.broadcast %cst_12 : f32 to vector<8x128xf32>
      %c0_13 = arith.constant 0 : index
      %c0_14 = arith.constant 0 : index
      %23 = vector.load %arg8[%c0_13, %c0_14] : memref<8x128xf32, #tpu.memory_space<vmem>>, vector<8x128xf32>
      tpu.vector_store %arg8[%c0_13, %c0_14], %22 {strides = array<i32>} : memref<8x128xf32, #tpu.memory_space<vmem>>, vector<8x128xf32>,
    } else {
    }
    %c0_i32_1 = arith.constant 0 : i32
    %5 = arith.cmpi slt, %1, %c0_i32_1 : i32
    %6 = arith.extui %5 : i1 to i32
    %c0_i32_2 = arith.constant 0 : i32
    %7 = arith.cmpi ne, %6, %c0_i32_2 : i32
    scf.if %7 {
      %c0 = arith.constant 0 : index
      %c0_11 = arith.constant 0 : index
      %20 = vector.load %arg2[%c0, %c0_11] : memref<32x128xf32, #tpu.memory_space<vmem>>, vector<32x128xf32>
      %21 = math.log %20 : vector<32x128xf32>
      %c0_12 = arith.constant 0 : index
      %c0_13 = arith.constant 0 : index
      %22 = vector.load %arg7[%c0_12, %c0_13] : memref<8x128xf32, #tpu.memory_space<vmem>>, vector<8x128xf32>
      %23 = vector.shape_cast %21 : vector<32x128xf32> to vector<4x8x128xf32>
      %cst = arith.constant dense<0.000000e+00> : vector<8x128xf32>
      %24 = vector.multi_reduction <add>, %23, %cst [0] : vector<4x8x128xf32> to vector<8x128xf32>
      %25 = arith.addf %22, %24 : vector<8x128xf32>
      %c0_14 = arith.constant 0 : index
      %c0_15 = arith.constant 0 : index
      %26 = vector.load %arg7[%c0_14, %c0_15] : memref<8x128xf32, #tpu.memory_space<vmem>>, vector<8x128xf32>
      tpu.vector_store %arg7[%c0_14, %c0_15], %25 {strides = array<i32>} : memref<8x128xf32, #tpu.memory_space<vmem>>, vector<8x128xf32>,
    } else {
    }
    %c0_i32_3 = arith.constant 0 : i32
    %8 = arith.cmpi eq, %1, %c0_i32_3 : i32
    %9 = arith.extui %8 : i1 to i32
    %c0_i32_4 = arith.constant 0 : i32
    %10 = arith.cmpi ne, %9, %c0_i32_4 : i32
    scf.if %10 {
      %c0 = arith.constant 0 : index
      %c0_11 = arith.constant 0 : index
      %20 = vector.load %arg2[%c0, %c0_11] : memref<32x128xf32, #tpu.memory_space<vmem>>, vector<32x128xf32>
      %c32_i32 = arith.constant 32 : i32
      %21 = arith.muli %1, %c32_i32 : i32
      %22 = tpu.iota {dimensions = array<i32: 0>} : vector<32x128xi32>
      %23 = vector.broadcast %21 : i32 to vector<32x128xi32>
      %24 = arith.addi %23, %22 : vector<32x128xi32>
      %c2_i32 = arith.constant 2 : i32
      %25 = vector.broadcast %c2_i32 : i32 to vector<32x128xi32>
      %26 = arith.cmpi slt, %24, %25 : vector<32x128xi32>
      %cst = arith.constant 1.000000e+00 : f32
      %27 = vector.broadcast %cst : f32 to vector<32x128xf32>
      %28 = arith.select %26, %20, %27 : vector<32x128xi1>, vector<32x128xf32>
      %29 = math.log %28 : vector<32x128xf32>
      %c0_12 = arith.constant 0 : index
      %c0_13 = arith.constant 0 : index
      %30 = vector.load %arg7[%c0_12, %c0_13] : memref<8x128xf32, #tpu.memory_space<vmem>>, vector<8x128xf32>
      %31 = vector.shape_cast %29 : vector<32x128xf32> to vector<4x8x128xf32>
      %cst_14 = arith.constant dense<0.000000e+00> : vector<8x128xf32>
      %32 = vector.multi_reduction <add>, %31, %cst_14 [0] : vector<4x8x128xf32> to vector<8x128xf32>
      %33 = arith.addf %30, %32 : vector<8x128xf32>
      %c0_15 = arith.constant 0 : index
      %c0_16 = arith.constant 0 : index
      %34 = vector.load %arg7[%c0_15, %c0_16] : memref<8x128xf32, #tpu.memory_space<vmem>>, vector<8x128xf32>
      tpu.vector_store %arg7[%c0_15, %c0_16], %33 {strides = array<i32>} : memref<8x128xf32, #tpu.memory_space<vmem>>, vector<8x128xf32>,
    } else {
    }
    %c0_i32_5 = arith.constant 0 : i32
    %11 = arith.cmpi slt, %1, %c0_i32_5 : i32
    %12 = arith.extui %11 : i1 to i32
    %c0_i32_6 = arith.constant 0 : i32
    %13 = arith.cmpi ne, %12, %c0_i32_6 : i32
    scf.if %13 {
      %c0 = arith.constant 0 : index
      %c0_11 = arith.constant 0 : index
      %20 = vector.load %arg3[%c0, %c0_11] : memref<32x128xf32, #tpu.memory_space<vmem>>, vector<32x128xf32>
      %c0_12 = arith.constant 0 : index
      %c0_13 = arith.constant 0 : index
      %21 = vector.load %arg4[%c0_12, %c0_13] : memref<32x128xf32, #tpu.memory_space<vmem>>, vector<32x128xf32>
      %22 = arith.subf %20, %21 : vector<32x128xf32>
      %c0_14 = arith.constant 0 : index
      %c0_15 = arith.constant 0 : index
      %23 = vector.load %arg8[%c0_14, %c0_15] : memref<8x128xf32, #tpu.memory_space<vmem>>, vector<8x128xf32>
      %24 = arith.mulf %22, %22 : vector<32x128xf32>
      %25 = vector.shape_cast %24 : vector<32x128xf32> to vector<4x8x128xf32>
      %cst = arith.constant dense<0.000000e+00> : vector<8x128xf32>
      %26 = vector.multi_reduction <add>, %25, %cst [0] : vector<4x8x128xf32> to vector<8x128xf32>
      %27 = arith.addf %23, %26 : vector<8x128xf32>
      %c0_16 = arith.constant 0 : index
      %c0_17 = arith.constant 0 : index
      %28 = vector.load %arg8[%c0_16, %c0_17] : memref<8x128xf32, #tpu.memory_space<vmem>>, vector<8x128xf32>
      tpu.vector_store %arg8[%c0_16, %c0_17], %27 {strides = array<i32>} : memref<8x128xf32, #tpu.memory_space<vmem>>, vector<8x128xf32>,
    } else {
    }
    %c0_i32_7 = arith.constant 0 : i32
    %14 = arith.cmpi eq, %1, %c0_i32_7 : i32
    %15 = arith.extui %14 : i1 to i32
    %c0_i32_8 = arith.constant 0 : i32
    %16 = arith.cmpi ne, %15, %c0_i32_8 : i32
    scf.if %16 {
      %c0 = arith.constant 0 : index
      %c0_11 = arith.constant 0 : index
      %20 = vector.load %arg3[%c0, %c0_11] : memref<32x128xf32, #tpu.memory_space<vmem>>, vector<32x128xf32>
      %c0_12 = arith.constant 0 : index
      %c0_13 = arith.constant 0 : index
      %21 = vector.load %arg4[%c0_12, %c0_13] : memref<32x128xf32, #tpu.memory_space<vmem>>, vector<32x128xf32>
      %22 = arith.subf %20, %21 : vector<32x128xf32>
      %c32_i32 = arith.constant 32 : i32
      %23 = arith.muli %1, %c32_i32 : i32
      %24 = tpu.iota {dimensions = array<i32: 0>} : vector<32x128xi32>
      %25 = vector.broadcast %23 : i32 to vector<32x128xi32>
      %26 = arith.addi %25, %24 : vector<32x128xi32>
      %c12_i32 = arith.constant 12 : i32
      %27 = vector.broadcast %c12_i32 : i32 to vector<32x128xi32>
      %28 = arith.cmpi slt, %26, %27 : vector<32x128xi32>
      %cst = arith.constant 0.000000e+00 : f32
      %29 = vector.broadcast %cst : f32 to vector<32x128xf32>
      %30 = arith.select %28, %22, %29 : vector<32x128xi1>, vector<32x128xf32>
      %c0_14 = arith.constant 0 : index
      %c0_15 = arith.constant 0 : index
      %31 = vector.load %arg8[%c0_14, %c0_15] : memref<8x128xf32, #tpu.memory_space<vmem>>, vector<8x128xf32>
      %32 = arith.mulf %30, %30 : vector<32x128xf32>
      %33 = vector.shape_cast %32 : vector<32x128xf32> to vector<4x8x128xf32>
      %cst_16 = arith.constant dense<0.000000e+00> : vector<8x128xf32>
      %34 = vector.multi_reduction <add>, %33, %cst_16 [0] : vector<4x8x128xf32> to vector<8x128xf32>
      %35 = arith.addf %31, %34 : vector<8x128xf32>
      %c0_17 = arith.constant 0 : index
      %c0_18 = arith.constant 0 : index
      %36 = vector.load %arg8[%c0_17, %c0_18] : memref<8x128xf32, #tpu.memory_space<vmem>>, vector<8x128xf32>
      tpu.vector_store %arg8[%c0_17, %c0_18], %35 {strides = array<i32>} : memref<8x128xf32, #tpu.memory_space<vmem>>, vector<8x128xf32>,
    } else {
    }
    %c0_i32_9 = arith.constant 0 : i32
    %17 = arith.cmpi eq, %arg1, %c0_i32_9 : i32
    %18 = arith.extui %17 : i1 to i32
    %c0_i32_10 = arith.constant 0 : i32
    %19 = arith.cmpi ne, %18, %c0_i32_10 : i32
    scf.if %19 {
      %c0 = arith.constant 0 : index
      %c0_11 = arith.constant 0 : index
      %20 = vector.load %arg7[%c0, %c0_11] : memref<8x128xf32, #tpu.memory_space<vmem>>, vector<8x128xf32>
      %21 = vector.shape_cast %20 : vector<8x128xf32> to vector<1x8x128xf32>
      %cst = arith.constant dense<0.000000e+00> : vector<1xf32>
      %22 = vector.multi_reduction <add>, %21, %cst [1, 2] : vector<1x8x128xf32> to vector<1xf32>
      %23 = vector.shape_cast %22 : vector<1xf32> to vector<1x1x1xf32>
      %24 = vector.extract %23[0, 0, 0] : f32 from vector<1x1x1xf32>
      %c0_12 = arith.constant 0 : index
      %c0_13 = arith.constant 0 : index
      %25 = memref.load %arg5[%c0_12, %c0_13] : memref<1x1xf32, #tpu.memory_space<smem>>
      memref.store %24, %arg5[%c0_12, %c0_13] : memref<1x1xf32, #tpu.memory_space<smem>>
      %c0_14 = arith.constant 0 : index
      %c0_15 = arith.constant 0 : index
      %26 = vector.load %arg8[%c0_14, %c0_15] : memref<8x128xf32, #tpu.memory_space<vmem>>, vector<8x128xf32>
      %27 = vector.shape_cast %26 : vector<8x128xf32> to vector<1x8x128xf32>
      %cst_16 = arith.constant dense<0.000000e+00> : vector<1xf32>
      %28 = vector.multi_reduction <add>, %27, %cst_16 [1, 2] : vector<1x8x128xf32> to vector<1xf32>
      %29 = vector.shape_cast %28 : vector<1xf32> to vector<1x1x1xf32>
      %30 = vector.extract %29[0, 0, 0] : f32 from vector<1x1x1xf32>
      %c0_17 = arith.constant 0 : index
      %c0_18 = arith.constant 0 : index
      %31 = memref.load %arg6[%c0_17, %c0_18] : memref<1x1xf32, #tpu.memory_space<smem>>
      memref.store %30, %arg6[%c0_17, %c0_18] : memref<1x1xf32, #tpu.memory_space<smem>>
    } else {
    }
    return
  }
  func.func @transform_0(%arg0: i32, %arg1: i32) -> (i32, i32) {
    %c1_i32 = arith.constant 1 : i32
    %0 = arith.muli %arg0, %c1_i32 : i32
    %1 = arith.addi %0, %arg1 : i32
    %c0_i32 = arith.constant 0 : i32
    %2 = arith.minsi %1, %c0_i32 : i32
    %c0_i32_0 = arith.constant 0 : i32
    %c0_i32_1 = arith.constant 0 : i32
    return %2, %c0_i32_0 : i32, i32
  }
  func.func @transform_1(%arg0: i32, %arg1: i32) -> (i32, i32) {
    %c1_i32 = arith.constant 1 : i32
    %0 = arith.muli %arg0, %c1_i32 : i32
    %1 = arith.addi %0, %arg1 : i32
    %c0_i32 = arith.constant 0 : i32
    %2 = arith.minsi %1, %c0_i32 : i32
    %c0_i32_0 = arith.constant 0 : i32
    %c0_i32_1 = arith.constant 0 : i32
    return %2, %c0_i32_0 : i32, i32
  }
  func.func @transform_2(%arg0: i32, %arg1: i32) -> (i32, i32) {
    %c1_i32 = arith.constant 1 : i32
    %0 = arith.muli %arg0, %c1_i32 : i32
    %1 = arith.addi %0, %arg1 : i32
    %c0_i32 = arith.constant 0 : i32
    %2 = arith.minsi %1, %c0_i32 : i32
    %c0_i32_0 = arith.constant 0 : i32
    %c0_i32_1 = arith.constant 0 : i32
    return %2, %c0_i32_0 : i32, i32
  }
  func.func @transform_3(%arg0: i32, %arg1: i32) -> (i32, i32) {
    %c0_i32 = arith.constant 0 : i32
    %c0_i32_0 = arith.constant 0 : i32
    return %arg0, %c0_i32 : i32, i32
  }
  func.func @transform_4(%arg0: i32, %arg1: i32) -> (i32, i32) {
    %c0_i32 = arith.constant 0 : i32
    %c0_i32_0 = arith.constant 0 : i32
    return %arg0, %c0_i32 : i32, i32
  }
}

</mosaic_0001>

<bundles_post_ra>
// kernel: tpu_custom_call.1
= control target key start
LH: loop header
LB: loop body
LE: loop exit
PB: predicated region body
PF: predicated region fallthrough
CT: control target
= control target key end

     0   :  { %10 = vsyncpa [#allocation5], 0  ;;  %s509_s0 = inlined_call_operand.hbm [shape: f32[2,128], index: 0, kind: input, shape index: {}]   ;;  %s510_s1 = inlined_call_operand.hbm [shape: f32[12,128], index: 1, kind: input, shape index: {}]   ;;  %s511_s2 = inlined_call_operand.hbm [shape: f32[12,128], index: 2, kind: input, shape index: {}]   ;;  %s512_s3 = inlined_call_operand.hbm [shape: f32[1,1], index: 3, kind: output, shape index: {0}]   ;;  %s513_s4 = inlined_call_operand.hbm [shape: f32[1,1], index: 4, kind: output, shape index: {1}]  }
   0x1   :  { %11 = vsyncpa [#allocation8], 0 }
   0x2   :  { %12 = vsyncpa [#allocation6], 0 }
   0x3   :  { %13 = vsyncpa [#allocation12], 0 }
   0x4   :  { %24 = vsyncadd [#allocation5], 480  ;;  %s415_s15 = smov [#allocation4]   ;;  %s321_s19 = scalar_lea.hbm %s509_s0, 32 }
   0x5   :  { %s29_s16 = sshll.u32 %s415_s15, 4  ;;  %p322_p0 = scmp.ne.s32.totalorder %s509_s0, %s321_s19  ;;  %s30_s16 = int_to_ptr.vmem [resolvable:$true] %s29_s16 }
   0x6   :  { %p325_p1 = scmp.lt.u32.totalorder %s321_s19, %s509_s0 }
   0x8   :  { %p327_p2 = pnand %p325_p1, %p322_p0 }
   0xa   :  { %330 = shalt.err (!%p327_p2)
}
   0xb   :  { %s331_s24 = scalar_lea.vmem %s30_s16, 32  ;;  %s335_s25 = scalar_lea.vmem %s30_s16, 512 }
   0xc   :  { %p332_p3 = scmp.ne.s32.totalorder %s30_s16, %s331_s24  ;;  %p336_p4 = scmp.lt.s32.totalorder %s30_s16, %s30_s16 }
   0xd   :  { %p337_p5 = scmp.lt.s32.totalorder %s335_s25, %s331_s24 }
   0xf   :  { %p338_p6 = por %p337_p5, %p336_p4 }
  0x11   :  { %p339_p7 = pnand %p338_p6, %p332_p3 }
  0x13   :  { %342 = shalt.err (!%p339_p7)
}
  0x14   :  { %s416_s26 = smov 32   ;;  %s417_s27 = smov 2  }
  0x15   :  { %35 = dma.hbm_to_vmem [thread:$0]  %s509_s0, 32, %s30_s16, [#allocation5], %s416_s26, %s416_s26, %s417_s27  }
  0x16   :  { %46 = vsyncadd [#allocation8], 256  ;;  %s418_s30 = smov [#allocation7]   ;;  %s343_s8 = scalar_lea.hbm %s510_s1, 256 }
  0x17   :  { %s51_s5 = sshll.u32 %s418_s30, 4  ;;  %p344_p8 = scmp.ne.s32.totalorder %s510_s1, %s343_s8  ;;  %s52_s5 = int_to_ptr.vmem [resolvable:$true] %s51_s5 }
  0x18   :  { %p347_p9 = scmp.lt.u32.totalorder %s343_s8, %s510_s1 }
  0x1a   :  { %p349_p10 = pnand %p347_p9, %p344_p8 }
  0x1c   :  { %352 = shalt.err (!%p349_p10)
}
  0x1d   :  { %s353_s13 = scalar_lea.vmem %s52_s5, 256  ;;  %s357_s0 = scalar_lea.vmem %s52_s5, 512 }
  0x1e   :  { %p354_p11 = scmp.ne.s32.totalorder %s52_s5, %s353_s13  ;;  %p358_p12 = scmp.lt.s32.totalorder %s52_s5, %s52_s5 }
  0x1f   :  { %p359_p13 = scmp.lt.s32.totalorder %s357_s0, %s353_s13 }
  0x21   :  { %p360_p0 = por %p359_p13, %p358_p12 }
  0x23   :  { %p361_p1 = pnand %p360_p0, %p354_p11 }
  0x25   :  { %364 = shalt.err (!%p361_p1)
}
  0x26   :  { %s419_s14 = smov 128   ;;  %s420_s15 = smov 8  }
  0x27   :  { %57 = dma.hbm_to_vmem [thread:$0]  %s510_s1, 256, %s52_s5, [#allocation8], %s419_s14, %s419_s14, %s420_s15  }
  0x28   :  { %68 = vsyncadd [#allocation8], 256  ;;  %s421_s18 = smov [#allocation9]   ;;  %s365_s22 = scalar_lea.hbm %s511_s2, 256 }
  0x29   :  { %s73_s19 = sshll.u32 %s421_s18, 4  ;;  %p366_p2 = scmp.ne.s32.totalorder %s511_s2, %s365_s22  ;;  %s74_s19 = int_to_ptr.vmem [resolvable:$true] %s73_s19 }
  0x2a   :  { %p369_p3 = scmp.lt.u32.totalorder %s365_s22, %s511_s2 }
  0x2c   :  { %p371_p4 = pnand %p369_p3, %p366_p2 }
  0x2e   :  { %374 = shalt.err (!%p371_p4)
}
  0x2f   :  { %s375_s27 = scalar_lea.vmem %s74_s19, 256  ;;  %s379_s1 = scalar_lea.vmem %s74_s19, 512 }
  0x30   :  { %p376_p5 = scmp.ne.s32.totalorder %s74_s19, %s375_s27  ;;  %p380_p6 = scmp.lt.s32.totalorder %s74_s19, %s74_s19 }
  0x31   :  { %p381_p7 = scmp.lt.s32.totalorder %s379_s1, %s375_s27 }
  0x33   :  { %p382_p8 = por %p381_p7, %p380_p6 }
  0x35   :  { %p383_p9 = pnand %p382_p8, %p376_p5 }
  0x37   :  { %386 = shalt.err (!%p383_p9)
}
  0x38   :  { %79 = dma.hbm_to_vmem [thread:$0]  %s511_s2, 256, %s74_s19, [#allocation8], %s419_s14, %s419_s14, %s420_s15  }
  0x39   :  { %407 = dma.done.wait [#allocation5], 512  }
  0x3a   :  { %408 = vsyncadd [#allocation5], 4294966784 }
  0x3b   :  { %409 = dma.done.wait [#allocation8], 1024  }
  0x3c   :  { %410 = vsyncadd [#allocation8], 4294966272  ;;  %v145_v0 = vlaneseq  ;;  %v140_v2 = vld [vmem:[#allocation4] sm:$0xff]  ;;  %v206_v4 = vld [vmem:[#allocation7 + $0x8] sm:$0xff]  ;;  %s387_s6 = scalar_lea.hbm %s512_s3, 16 }
  0x3d   :  { %v210_v5 = vld [vmem:[#allocation9 + $0x8] sm:$0xff]  ;;  %v205_v7 = vld [vmem:[#allocation7] sm:$0xff]  ;;  %p388_p10 = scmp.ne.s32.totalorder %s512_s3, %s387_s6  ;;  %p391_p11 = scmp.lt.u32.totalorder %s387_s6, %s512_s3 }
  0x3e   :  { %v146_v1 = vshrl.u32 %v145_v0, 7  ;;  %v209_v8 = vld [vmem:[#allocation9] sm:$0xff]  ;;  %v214_v9 = vsub.f32 %v206_v4, %v210_v5 }
  0x3f   :  { %v213_v10 = vsub.f32 %v205_v7, %v209_v8  ;;  %p393_p12 = pnand %p391_p11, %p388_p10 }
  0x40   :  { %vm155_vm0 = vcmp.lt.s32.totalorder %v146_v1, 2  ;;  %v220_v6 = vadd.s32 8, %v146_v1 }
  0x41   :  { %v159_v3 = vsel %vm155_vm0, %v140_v2, 1.0  ;;  %v237_v12 = vmul.f32 %v213_v10, %v213_v10 }
  0x42   :  { %319 = vlog2.f32 %v159_v3  ;;  %vm229_vm1 = vcmp.lt.s32.totalorder %v220_v6, 12 }
  0x43   :  { %v233_v11 = vsel %vm229_vm1, %v214_v9, 0.0 }
  0x44   :  { %v238_v13 = vmul.f32 %v233_v11, %v233_v11 }
  0x46   :  { %v241_v16 = vadd.f32 %v238_v13, %v237_v12 }
  0x4c   :  { %v320_v14 = vpop.eup %319 }
  0x4d   :  { %v164_v15 = vmul.f32 0.6931472, %v320_v14 }
  0x4f   :  { %250 = vadd.xlane.f32.xlu0 %v164_v15 }
  0x53   :  { %262 = vadd.xlane.f32.xlu0 %v241_v16 }
  0xdc   :  { %v251_v17 = vpop.xlane.xlu0 %250 }
  0xdd   :  { %v252_v18 = vrot.slane %v251_v17, 4 }
  0xdf   :  { %v253_v19 = vadd.f32 %v252_v18, %v251_v17 }
  0xe0   :  { %v263_v20 = vpop.xlane.xlu0 %262 }
  0xe1   :  { %v254_v21 = vrot.slane %v253_v19, 2  ;;  %v264_v22 = vrot.slane %v263_v20, 4 }
  0xe3   :  { %v265_v23 = vadd.f32 %v264_v22, %v263_v20  ;;  %v255_v24 = vadd.f32 %v254_v21, %v253_v19 }
  0xe5   :  { %v266_v25 = vrot.slane %v265_v23, 2  ;;  %v256_v26 = vrot.slane %v255_v24, 1 }
  0xe7   :  { %v267_v27 = vadd.f32 %v266_v25, %v265_v23  ;;  %v257_v28 = vadd.f32 %v256_v26, %v255_v24 }
  0xe9   :  { %306 = vpush %v257_v28  ;;  %v268_v29 = vrot.slane %v267_v27, 1 }
  0xeb   :  { %v269_v30 = vadd.f32 %v268_v29, %v267_v27 }
  0xed   :  { %308 = vpush %v269_v30 }
 0x11a   :  { %s307_s2 = spop %306 }
 0x11b   :  { %260 = sst [smem:[#allocation10]] %s307_s2 }
 0x11c   :  { %396 = shalt.err (!%p393_p12)
}
 0x11d   :  { %s422_s11 = smov [#allocation10]   ;;  %s397_s16 = scalar_lea.hbm %s513_s4, 16 }
 0x11e   :  { %280 = dma.smem_to_hbm %s422_s11, 16, %s512_s3, [#allocation6]  }
 0x11f   :  { %s309_s0 = spop %308  ;;  %p398_p13 = scmp.ne.s32.totalorder %s513_s4, %s397_s16 }
 0x120   :  { %272 = sst [smem:[#allocation11]] %s309_s0  ;;  %p401_p0 = scmp.lt.u32.totalorder %s397_s16, %s513_s4 }
 0x122   :  { %p403_p1 = pnand %p401_p0, %p398_p13 }
 0x124   :  { %406 = shalt.err (!%p403_p1)
}
 0x125   :  { %s423_s21 = smov [#allocation11]  }
 0x126   :  { %288 = dma.smem_to_hbm %s423_s21, 16, %s513_s4, [#allocation12]  }
 0x127   :  { %411 = dma.done.wait [#allocation6], 16  }
 0x128   :  { %412 = vsyncadd [#allocation6], 4294967280 }
 0x129   :  { %413 = dma.done.wait [#allocation12], 16  }
 0x12a   :  { %414 = vsyncadd [#allocation12], 4294967280 }
 0x12b   :  { %295 = sfence }
 0x12c   :  { %296 = vsyncpa [#allocation5], 1 }
 0x12d   :  { %297 = vsyncpa [#allocation8], 1 }
 0x12e   :  { %298 = vsyncpa [#allocation6], 1 }
 0x12f   :  { %299 = vsyncpa [#allocation12], 1 }

</bundles_post_ra>
